<compile_context>
chip_gen: v7x
topology: tpu7x:2x2x1
jax: 0.10.0
libtpu: 0.0.40
codegen_flags: <defaults>
</compile_context>

<pallas_src>
import functools

import jax
import jax.numpy as jnp
from jax.experimental import pallas as pl
from jax.experimental.pallas import tpu as pltpu

LANE = 128  # fc4 weight/bias are zero-padded to this output width for the MXU


def dqn_kernel(x_ref, w1_ref, b1_ref, w2_ref, b2_ref,
               w3_ref, b3_ref, w4_ref, b4_ref, out_ref):
    cdt = w1_ref.dtype
    # x arrives f32 straight from HBM; cast to the MXU compute dtype here
    # (VPU slots have plenty of slack; saves a wrapper-side HBM round trip).
    x = x_ref[...].astype(cdt)
    h = jnp.dot(x, w1_ref[...], preferred_element_type=jnp.float32) + b1_ref[...]
    h = jnp.maximum(h, 0.0).astype(cdt)
    h = jnp.dot(h, w2_ref[...], preferred_element_type=jnp.float32) + b2_ref[...]
    h = jnp.maximum(h, 0.0).astype(cdt)
    h = jnp.dot(h, w3_ref[...], preferred_element_type=jnp.float32) + b3_ref[...]
    h = jnp.maximum(h, 0.0).astype(cdt)
    h = jnp.dot(h, w4_ref[...], preferred_element_type=jnp.float32) + b4_ref[...]
    # Narrow store: only the real action columns go back to HBM (padded MXU
    # columns are dropped here instead of in a separate wrapper slice pass).
    out_ref[...] = h[:, :out_ref.shape[-1]].astype(out_ref.dtype)


def _round_up(x, m):
    return (x + m - 1) // m * m


def _choose_bb(B, max_bb=512):
    """Batch-tile size.

    B <= 128: one full-batch step (latency path, no masking, no extra steps).
    B  > 128: an even number (>=2) of balanced steps, each <= ~max_bb rows:
      - even step count keeps v7x's two TensorCores balanced,
      - few fat steps keep the ~0.35us/step overhead low on v5e/v6e.
    """
    if B <= 128:
        return B
    n = max(2, pl.cdiv(B, max_bb))
    if n % 2:
        n += 1
    return _round_up(pl.cdiv(B, n), 8)


@functools.partial(jax.jit, static_argnames=("action_size",))
def dqn_forward(x, params, action_size):
    """x: (B, state_size) f32. params: prepared dict (see prepare_params)."""
    B, state_size = x.shape
    out_pad = params["w4"].shape[1]  # lane-dense padded fc4 width (128)

    bb = _choose_bb(B)
    n_blocks = pl.cdiv(B, bb)  # ragged B handled by Pallas boundary blocks

    # Weights/biases: constant block index across the grid -> resident in
    # VMEM, Pallas does not re-issue their DMA between grid steps.
    def full_spec(arr):
        return pl.BlockSpec(arr.shape, lambda i: (0, 0))

    flops = 2 * B * (state_size * 128 + 128 * 128 + 128 * 64 + 64 * out_pad)
    bytes_accessed = (
        x.size * x.dtype.itemsize
        + sum(v.size * v.dtype.itemsize for v in params.values())
        + B * action_size * 4)

    out = pl.pallas_call(
        dqn_kernel,
        out_shape=jax.ShapeDtypeStruct((B, action_size), jnp.float32),
        grid_spec=pltpu.PrefetchScalarGridSpec(
            num_scalar_prefetch=0,
            grid=(n_blocks,),
            in_specs=[
                pl.BlockSpec((bb, state_size), lambda i: (i, 0)),
                full_spec(params["w1"]), full_spec(params["b1"]),
                full_spec(params["w2"]), full_spec(params["b2"]),
                full_spec(params["w3"]), full_spec(params["b3"]),
                full_spec(params["w4"]), full_spec(params["b4"]),
            ],
            out_specs=pl.BlockSpec((bb, action_size), lambda i: (i, 0)),
        ),
        compiler_params=pltpu.CompilerParams(
            dimension_semantics=("parallel",)),
        cost_estimate=pl.CostEstimate(
            flops=flops, transcendentals=0, bytes_accessed=bytes_accessed),
    )(x,
      params["w1"], params["b1"],
      params["w2"], params["b2"],
      params["w3"], params["b3"],
      params["w4"], params["b4"])
    return out


def init_params(key, state_size, action_size):
    """nn.Linear-style init (uniform +-1/sqrt(fan_in)). Weights stored
    (in, out); biases (1, out). All f32 (master copy)."""
    dims = [(state_size, 128), (128, 128), (128, 64), (64, action_size)]
    params = {}
    for idx, (fan_in, fan_out) in enumerate(dims, start=1):
        key, kw, kb = jax.random.split(key, 3)
        bound = 1.0 / jnp.sqrt(jnp.float32(fan_in))
        params[f"w{idx}"] = jax.random.uniform(
            kw, (fan_in, fan_out), jnp.float32, -bound, bound)
        params[f"b{idx}"] = jax.random.uniform(
            kb, (1, fan_out), jnp.float32, -bound, bound)
    return params


def prepare_params(params, compute_dtype=jnp.bfloat16, lane_pad=LANE):
    """Cast weights to the MXU compute dtype; zero-pad fc4 to a lane-dense
    (multiple-of-128) width. Biases stay f32 (added to the f32 accumulator).
    NOTE: bf16 compute matches the f32 reference only to ~3e-2; pass
    compute_dtype=jnp.float32 if exact argmax parity with PyTorch matters."""
    p = {}
    for i in (1, 2, 3):
        p[f"w{i}"] = params[f"w{i}"].astype(compute_dtype)
        p[f"b{i}"] = params[f"b{i}"].astype(jnp.float32)
    w4, b4 = params["w4"], params["b4"]
    pad = (-w4.shape[1]) % lane_pad
    p["w4"] = jnp.pad(w4, ((0, 0), (0, pad))).astype(compute_dtype)
    p["b4"] = jnp.pad(b4, ((0, 0), (0, pad))).astype(jnp.float32)
    return p


def dqn_reference(x, params):
    h = jnp.maximum(x @ params["w1"] + params["b1"], 0.0)
    h = jnp.maximum(h @ params["w2"] + params["b2"], 0.0)
    h = jnp.maximum(h @ params["w3"] + params["b3"], 0.0)
    return h @ params["w4"] + params["b4"]


if __name__ == "__main__":
    key = jax.random.PRNGKey(0)
    state_size, action_size, batch = 16, 4, 8

    kx, kp, kx2 = jax.random.split(key, 3)
    x = jax.random.normal(kx, (batch, state_size), jnp.float32)
    params = init_params(kp, state_size, action_size)
    prepared = prepare_params(params, compute_dtype=jnp.bfloat16)

    # Small-batch (inference/latency) path: one grid step, no padding copies.
    out = jax.block_until_ready(dqn_forward(x, prepared, action_size=action_size))
    ref = dqn_reference(x, params)
    assert out.shape == (batch, action_size)
    assert jnp.allclose(out, ref, atol=3e-2, rtol=3e-2), "mismatch (small batch)"

    # Large ragged batch: 2 balanced parallel steps, last block partially
    # out-of-bounds (exercises Pallas boundary-block handling, no jnp.pad).
    x_big = jax.random.normal(kx2, (600, state_size), jnp.float32)
    out_big = jax.block_until_ready(
        dqn_forward(x_big, prepared, action_size=action_size))
    ref_big = dqn_reference(x_big, params)
    assert out_big.shape == (600, action_size)
    assert jnp.allclose(out_big, ref_big, atol=3e-2, rtol=3e-2), "mismatch (tiled)"

    print("KERNEL_OK")
</pallas_src>

<mosaic_0001>
module attributes {stable_mosaic.version = 11 : i64} {
  func.func @dqn_kernel(%arg0: i32, %arg1: memref<8x16xf32, #tpu.memory_space<vmem>>, %arg2: memref<16x128xbf16, #tpu.memory_space<vmem>>, %arg3: memref<1x128xf32, #tpu.memory_space<vmem>>, %arg4: memref<128x128xbf16, #tpu.memory_space<vmem>>, %arg5: memref<1x128xf32, #tpu.memory_space<vmem>>, %arg6: memref<128x64xbf16, #tpu.memory_space<vmem>>, %arg7: memref<1x64xf32, #tpu.memory_space<vmem>>, %arg8: memref<64x128xbf16, #tpu.memory_space<vmem>>, %arg9: memref<1x128xf32, #tpu.memory_space<vmem>>, %arg10: memref<8x4xf32, #tpu.memory_space<vmem>>) attributes {dimension_semantics = [#tpu.dimension_semantics<parallel>], iteration_bounds = array<i64: 1>, scalar_prefetch = 0 : i64, scratch_operands = 0 : i64, tpu.core_type = #tpu.core_type<tc>, window_params = [{transform_indices = @transform_0, window_bounds = array<i64: 8, 16>}, {pipeline_mode = #tpu.pipeline_mode<synchronous>, transform_indices = @transform_1, window_bounds = array<i64: 16, 128>}, {pipeline_mode = #tpu.pipeline_mode<synchronous>, transform_indices = @transform_2, window_bounds = array<i64: 1, 128>}, {pipeline_mode = #tpu.pipeline_mode<synchronous>, transform_indices = @transform_3, window_bounds = array<i64: 128, 128>}, {pipeline_mode = #tpu.pipeline_mode<synchronous>, transform_indices = @transform_4, window_bounds = array<i64: 1, 128>}, {pipeline_mode = #tpu.pipeline_mode<synchronous>, transform_indices = @transform_5, window_bounds = array<i64: 128, 64>}, {pipeline_mode = #tpu.pipeline_mode<synchronous>, transform_indices = @transform_6, window_bounds = array<i64: 1, 64>}, {pipeline_mode = #tpu.pipeline_mode<synchronous>, transform_indices = @transform_7, window_bounds = array<i64: 64, 128>}, {pipeline_mode = #tpu.pipeline_mode<synchronous>, transform_indices = @transform_8, window_bounds = array<i64: 1, 128>}, {transform_indices = @transform_9, window_bounds = array<i64: 8, 4>}]} {
    %c0 = arith.constant 0 : index
    %c0_0 = arith.constant 0 : index
    %0 = vector.load %arg1[%c0, %c0_0] : memref<8x16xf32, #tpu.memory_space<vmem>>, vector<8x16xf32>
    %1 = arith.truncf %0 : vector<8x16xf32> to vector<8x16xbf16>
    %c0_1 = arith.constant 0 : index
    %c0_2 = arith.constant 0 : index
    %2 = vector.load %arg2[%c0_1, %c0_2] : memref<16x128xbf16, #tpu.memory_space<vmem>>, vector<16x128xbf16>
    %cst = arith.constant dense<0.000000e+00> : vector<8x128xf32>
    %3 = tpu.matmul %1, %2, %cst {dimension_numbers = #tpu.dot_dimension_numbers<[1], [0], [0], [1], [0, 0, 1, 1], [], []>} : vector<8x16xbf16>, vector<16x128xbf16>, vector<8x128xf32> -> vector<8x128xf32>
    %c0_3 = arith.constant 0 : index
    %c0_4 = arith.constant 0 : index
    %4 = vector.load %arg3[%c0_3, %c0_4] : memref<1x128xf32, #tpu.memory_space<vmem>>, vector<1x128xf32>
    %5 = vector.broadcast %4 : vector<1x128xf32> to vector<8x128xf32>
    %6 = arith.addf %3, %5 : vector<8x128xf32>
    %cst_5 = arith.constant 0.000000e+00 : f32
    %7 = vector.broadcast %cst_5 : f32 to vector<8x128xf32>
    %8 = arith.maximumf %6, %7 : vector<8x128xf32>
    %9 = arith.truncf %8 : vector<8x128xf32> to vector<8x128xbf16>
    %c0_6 = arith.constant 0 : index
    %c0_7 = arith.constant 0 : index
    %10 = vector.load %arg4[%c0_6, %c0_7] : memref<128x128xbf16, #tpu.memory_space<vmem>>, vector<128x128xbf16>
    %cst_8 = arith.constant dense<0.000000e+00> : vector<8x128xf32>
    %11 = tpu.matmul %9, %10, %cst_8 {dimension_numbers = #tpu.dot_dimension_numbers<[1], [0], [0], [1], [0, 0, 1, 1], [], []>} : vector<8x128xbf16>, vector<128x128xbf16>, vector<8x128xf32> -> vector<8x128xf32>
    %c0_9 = arith.constant 0 : index
    %c0_10 = arith.constant 0 : index
    %12 = vector.load %arg5[%c0_9, %c0_10] : memref<1x128xf32, #tpu.memory_space<vmem>>, vector<1x128xf32>
    %13 = vector.broadcast %12 : vector<1x128xf32> to vector<8x128xf32>
    %14 = arith.addf %11, %13 : vector<8x128xf32>
    %cst_11 = arith.constant 0.000000e+00 : f32
    %15 = vector.broadcast %cst_11 : f32 to vector<8x128xf32>
    %16 = arith.maximumf %14, %15 : vector<8x128xf32>
    %17 = arith.truncf %16 : vector<8x128xf32> to vector<8x128xbf16>
    %c0_12 = arith.constant 0 : index
    %c0_13 = arith.constant 0 : index
    %18 = vector.load %arg6[%c0_12, %c0_13] : memref<128x64xbf16, #tpu.memory_space<vmem>>, vector<128x64xbf16>
    %cst_14 = arith.constant dense<0.000000e+00> : vector<8x64xf32>
    %19 = tpu.matmul %17, %18, %cst_14 {dimension_numbers = #tpu.dot_dimension_numbers<[1], [0], [0], [1], [0, 0, 1, 1], [], []>} : vector<8x128xbf16>, vector<128x64xbf16>, vector<8x64xf32> -> vector<8x64xf32>
    %c0_15 = arith.constant 0 : index
    %c0_16 = arith.constant 0 : index
    %20 = vector.load %arg7[%c0_15, %c0_16] : memref<1x64xf32, #tpu.memory_space<vmem>>, vector<1x64xf32>
    %21 = vector.broadcast %20 : vector<1x64xf32> to vector<8x64xf32>
    %22 = arith.addf %19, %21 : vector<8x64xf32>
    %cst_17 = arith.constant 0.000000e+00 : f32
    %23 = vector.broadcast %cst_17 : f32 to vector<8x64xf32>
    %24 = arith.maximumf %22, %23 : vector<8x64xf32>
    %25 = arith.truncf %24 : vector<8x64xf32> to vector<8x64xbf16>
    %c0_18 = arith.constant 0 : index
    %c0_19 = arith.constant 0 : index
    %26 = vector.load %arg8[%c0_18, %c0_19] : memref<64x128xbf16, #tpu.memory_space<vmem>>, vector<64x128xbf16>
    %cst_20 = arith.constant dense<0.000000e+00> : vector<8x128xf32>
    %27 = tpu.matmul %25, %26, %cst_20 {dimension_numbers = #tpu.dot_dimension_numbers<[1], [0], [0], [1], [0, 0, 1, 1], [], []>} : vector<8x64xbf16>, vector<64x128xbf16>, vector<8x128xf32> -> vector<8x128xf32>
    %c0_21 = arith.constant 0 : index
    %c0_22 = arith.constant 0 : index
    %28 = vector.load %arg9[%c0_21, %c0_22] : memref<1x128xf32, #tpu.memory_space<vmem>>, vector<1x128xf32>
    %29 = vector.broadcast %28 : vector<1x128xf32> to vector<8x128xf32>
    %30 = arith.addf %27, %29 : vector<8x128xf32>
    %31 = vector.extract_strided_slice %30 {offsets = [0, 0], sizes = [8, 4], strides = [1, 1]} : vector<8x128xf32> to vector<8x4xf32>
    %c0_23 = arith.constant 0 : index
    %c0_24 = arith.constant 0 : index
    %32 = vector.load %arg10[%c0_23, %c0_24] : memref<8x4xf32, #tpu.memory_space<vmem>>, vector<8x4xf32>
    tpu.vector_store %arg10[%c0_23, %c0_24], %31 {strides = array<i32>} : memref<8x4xf32, #tpu.memory_space<vmem>>, vector<8x4xf32>,
    return
  }
  func.func @transform_0(%arg0: i32) -> (i32, i32) {
    %c0_i32 = arith.constant 0 : i32
    %c0_i32_0 = arith.constant 0 : i32
    return %arg0, %c0_i32 : i32, i32
  }
  func.func @transform_1(%arg0: i32) -> (i32, i32) {
    %c0_i32 = arith.constant 0 : i32
    %c0_i32_0 = arith.constant 0 : i32
    %c0_i32_1 = arith.constant 0 : i32
    return %c0_i32, %c0_i32_0 : i32, i32
  }
  func.func @transform_2(%arg0: i32) -> (i32, i32) {
    %c0_i32 = arith.constant 0 : i32
    %c0_i32_0 = arith.constant 0 : i32
    %c0_i32_1 = arith.constant 0 : i32
    return %c0_i32, %c0_i32_0 : i32, i32
  }
  func.func @transform_3(%arg0: i32) -> (i32, i32) {
    %c0_i32 = arith.constant 0 : i32
    %c0_i32_0 = arith.constant 0 : i32
    %c0_i32_1 = arith.constant 0 : i32
    return %c0_i32, %c0_i32_0 : i32, i32
  }
  func.func @transform_4(%arg0: i32) -> (i32, i32) {
    %c0_i32 = arith.constant 0 : i32
    %c0_i32_0 = arith.constant 0 : i32
    %c0_i32_1 = arith.constant 0 : i32
    return %c0_i32, %c0_i32_0 : i32, i32
  }
  func.func @transform_5(%arg0: i32) -> (i32, i32) {
    %c0_i32 = arith.constant 0 : i32
    %c0_i32_0 = arith.constant 0 : i32
    %c0_i32_1 = arith.constant 0 : i32
    return %c0_i32, %c0_i32_0 : i32, i32
  }
  func.func @transform_6(%arg0: i32) -> (i32, i32) {
    %c0_i32 = arith.constant 0 : i32
    %c0_i32_0 = arith.constant 0 : i32
    %c0_i32_1 = arith.constant 0 : i32
    return %c0_i32, %c0_i32_0 : i32, i32
  }
  func.func @transform_7(%arg0: i32) -> (i32, i32) {
    %c0_i32 = arith.constant 0 : i32
    %c0_i32_0 = arith.constant 0 : i32
    %c0_i32_1 = arith.constant 0 : i32
    return %c0_i32, %c0_i32_0 : i32, i32
  }
  func.func @transform_8(%arg0: i32) -> (i32, i32) {
    %c0_i32 = arith.constant 0 : i32
    %c0_i32_0 = arith.constant 0 : i32
    %c0_i32_1 = arith.constant 0 : i32
    return %c0_i32, %c0_i32_0 : i32, i32
  }
  func.func @transform_9(%arg0: i32) -> (i32, i32) {
    %c0_i32 = arith.constant 0 : i32
    %c0_i32_0 = arith.constant 0 : i32
    return %arg0, %c0_i32 : i32, i32
  }
}

</mosaic_0001>

<bundles_post_ra>
// kernel: dqn_forward.1
= control target key start
LH: loop header
LB: loop body
LE: loop exit
PB: predicated region body
PF: predicated region fallthrough
CT: control target
= control target key end

     0   :  { %v544_v0 = vmov 0.0   ;;  %vm545_vm0 = vmmov 0   ;;  %vm50_vm1 = vcmask 130048   ;;  %vm361_vm2 = vcmask 523264   ;;  %s706_s1 = inlined_call_operand.vmem [shape: bf16[16,128], index: 1, kind: input, shape index: {}]   ;;  %s707_s0 = inlined_call_operand.vmem [shape: f32[8,16], index: 0, kind: input, shape index: {}]   ;;  %s708_s3 = inlined_call_operand.vmem [shape: bf16[128,128], index: 3, kind: input, shape index: {}]   ;;  %s709_s5 = inlined_call_operand.vmem [shape: bf16[128,64], index: 5, kind: input, shape index: {}]   ;;  %s710_s2 = inlined_call_operand.vmem [shape: f32[1,128], index: 2, kind: input, shape index: {}]   ;;  %s711_s7 = inlined_call_operand.vmem [shape: bf16[64,128], index: 7, kind: input, shape index: {}]   ;;  %s712_s4 = inlined_call_operand.vmem [shape: f32[1,128], index: 4, kind: input, shape index: {}]   ;;  %s713_s6 = inlined_call_operand.vmem [shape: f32[1,64], index: 6, kind: input, shape index: {}]   ;;  %s714_s8 = inlined_call_operand.vmem [shape: f32[1,128], index: 8, kind: input, shape index: {}]   ;;  %s715_s9 = inlined_call_operand.vmem [shape: f32[8,4], index: 9, kind: output, shape index: {}]  }
   0x1   :  { %463 = vmatprep.subr.bf16.mxu0 %v544_v0  ;;  %v523_v1 = vld [vmem:[%s706_s1] sm:$0xff]   ;;  %465 = vmatprep.mubr.msk.bf16.mxu0 %vm545_vm0, %v544_v0  ;;  %v525_v5 = vld [vmem:[%s708_s3 + $0x8] sm:$0xff]   ;;  %v526_v6 = vld [vmem:[%s708_s3 + $0x10] sm:$0xff]   ;;  %vm405_vm3 = vcmask 31744  }
   0x2   :  { %v33_v2 = vld [vmem:[%s707_s0] sm:$0xff]  ;;  %469 = vmatprep.subr.bf16.mxu1 %v544_v0  ;;  %485 = vmatprep.mubr.msk.bf16.mxu1 %vm545_vm0, %v544_v0  ;;  %v527_v7 = vld [vmem:[%s708_s3 + $0x18] sm:$0xff]   ;;  %v529_v9 = vld [vmem:[%s708_s3 + $0x28] sm:$0xff]  }
   0x3   :  { %464 = vmatpush3.bf16.msra.mxu0 %v523_v1  ;;  %v34_v3 = vpack.c.bf16 %v33_v2, %v33_v2  ;;  %v524_v4 = vld [vmem:[%s708_s3] sm:$0xff]   ;;  %v530_v10 = vld [vmem:[%s708_s3 + $0x30] sm:$0xff]   ;;  %v531_v11 = vld [vmem:[%s708_s3 + $0x38] sm:$0xff]  }
   0x4   :  { %489 = vmatprep.subr.bf16.mxu0 %v544_v0  ;;  %470 = vmatpush3.bf16.msra.mxu1 %v524_v4  ;;  %v528_v8 = vld [vmem:[%s708_s3 + $0x20] sm:$0xff]   ;;  %v533_v13 = vld [vmem:[%s709_s5 + $0x8] sm:$0xff]   ;;  %v534_v14 = vld [vmem:[%s709_s5 + $0x10] sm:$0xff]  }
   0x5   :  { %471 = vmatprep.subr.bf16.mxu1 %v544_v0  ;;  %v532_v12 = vld [vmem:[%s709_s5] sm:$0xff]   ;;  %v535_v15 = vld [vmem:[%s709_s5 + $0x18] sm:$0xff]   ;;  %v537_v17 = vld [vmem:[%s709_s5 + $0x28] sm:$0xff]  }
   0x6   :  { %466 = vmatmul.mubr.msk.bf16.vlgmr.msra.gmra.mrb[0].mxu0 %vm50_vm1, %v34_v3  ;;  %v536_v16 = vld [vmem:[%s709_s5 + $0x20] sm:$0xff]   ;;  %v538_v26 = vld [vmem:[%s709_s5 + $0x30] sm:$0xff]   ;;  %v539_v27 = vld [vmem:[%s709_s5 + $0x38] sm:$0xff]  }
   0x7   :  { %505 = vmatprep.mubr.msk.bf16.mxu0 %vm545_vm0, %v544_v0  ;;  %490 = vmatpush3.bf16.msra.mxu0 %v532_v12  ;;  %v411_v18 = vld [vmem:[%s710_s2] ss:$0 sm:$0xff]  ;;  %v541_v29 = vld [vmem:[%s711_s7 + $0x8] sm:$0xff]   ;;  %v542_v38 = vld [vmem:[%s711_s7 + $0x10] sm:$0xff]  }
   0x8   :  { %472 = vmatpush3.bf16.msra.mxu1 %v525_v5  ;;  %491 = vmatprep.subr.bf16.mxu0 %v544_v0  ;;  %v540_v28 = vld [vmem:[%s711_s7] sm:$0xff]   ;;  %v543_v39 = vld [vmem:[%s711_s7 + $0x18] sm:$0xff]  }
   0x9   :  { %473 = vmatprep.subr.bf16.mxu1 %v544_v0  ;;  %v414_v30 = vld [vmem:[%s712_s4] ss:$0 sm:$0xff] }
   0xa   :  { %v423_v40 = vld [vmem:[%s713_s6] ss:$0 sm:$0xff] }
   0xb   :  { %492 = vmatpush3.bf16.msra.mxu0 %v533_v13  ;;  %v432_v48 = vld [vmem:[%s714_s8] ss:$0 sm:$0xff] }
   0xc   :  { %474 = vmatpush3.bf16.msra.mxu1 %v526_v6  ;;  %493 = vmatprep.subr.bf16.mxu0 %v544_v0 }
   0xd   :  { %475 = vmatprep.subr.bf16.mxu1 %v544_v0 }
   0xf   :  { %494 = vmatpush3.bf16.msra.mxu0 %v534_v14 }
  0x10   :  { %476 = vmatpush3.bf16.msra.mxu1 %v527_v7  ;;  %495 = vmatprep.subr.bf16.mxu0 %v544_v0 }
  0x11   :  { %477 = vmatprep.subr.bf16.mxu1 %v544_v0 }
  0x13   :  { %496 = vmatpush3.bf16.msra.mxu0 %v535_v15 }
  0x14   :  { %478 = vmatpush3.bf16.msra.mxu1 %v528_v8  ;;  %497 = vmatprep.subr.bf16.mxu0 %v544_v0 }
  0x15   :  { %479 = vmatprep.subr.bf16.mxu1 %v544_v0 }
  0x17   :  { %498 = vmatpush3.bf16.msra.mxu0 %v536_v16 }
  0x18   :  { %480 = vmatpush3.bf16.msra.mxu1 %v529_v9  ;;  %499 = vmatprep.subr.bf16.mxu0 %v544_v0 }
  0x19   :  { %481 = vmatprep.subr.bf16.mxu1 %v544_v0 }
  0x1b   :  { %500 = vmatpush3.bf16.msra.mxu0 %v537_v17 }
  0x1c   :  { %482 = vmatpush3.bf16.msra.mxu1 %v530_v10  ;;  %501 = vmatprep.subr.bf16.mxu0 %v544_v0 }
  0x1d   :  { %483 = vmatprep.subr.bf16.mxu1 %v544_v0 }
  0x1f   :  { %502 = vmatpush3.bf16.msra.mxu0 %v538_v26 }
  0x20   :  { %484 = vmatpush3.bf16.msra.mxu1 %v531_v11  ;;  %503 = vmatprep.subr.bf16.mxu0 %v544_v0 }
  0x21   :  { %509 = vmatprep.subr.bf16.mxu1 %v544_v0 }
  0x23   :  { %504 = vmatpush3.bf16.msra.mxu0 %v539_v27 }
  0xd9   :  { %v88_v19 = vpop.f32.mrb[0].mxu0 }
  0xda   :  { %v89_v20 = vadd.f32 %v411_v18, %v88_v19  ;;  %v467_v21 = vpop.f32.mrb[1].mxu0 }
  0xdb   :  { %v91_v22 = vpop.f32.mrb[2].mxu0 }
  0xdc   :  { %v94_v23 = vmax.f32 %v89_v20, 0.0  ;;  %v468_v24 = vpop.f32.mrb[3].mxu0 }
  0xde   :  { %v95_v25 = vpack.c.bf16 %v94_v23, %v94_v23 }
  0xe0   :  { %486 = vmatmul.mubr.bf16.vlgmr.msra.gmra.mrb[0].mxu1 %v95_v25 }
  0xe1   :  { %517 = vmatprep.mubr.msk.bf16.mxu1 %vm545_vm0, %v544_v0  ;;  %510 = vmatpush3.bf16.msra.mxu1 %v540_v28 }
  0xe2   :  { %511 = vmatprep.subr.bf16.mxu1 %v544_v0 }
  0xe5   :  { %512 = vmatpush3.bf16.msra.mxu1 %v541_v29 }
  0xe6   :  { %513 = vmatprep.subr.bf16.mxu1 %v544_v0 }
  0xe9   :  { %514 = vmatpush3.bf16.msra.mxu1 %v542_v38 }
  0xea   :  { %515 = vmatprep.subr.bf16.mxu1 %v544_v0 }
  0xed   :  { %516 = vmatpush3.bf16.msra.mxu1 %v543_v39 }
 0x1b3   :  { %v201_v31 = vpop.f32.mrb[0].mxu1 }
 0x1b4   :  { %v202_v32 = vadd.f32 %v414_v30, %v201_v31  ;;  %v487_v33 = vpop.f32.mrb[1].mxu1 }
 0x1b5   :  { %v204_v34 = vpop.f32.mrb[2].mxu1 }
 0x1b6   :  { %v207_v35 = vmax.f32 %v202_v32, 0.0  ;;  %v488_v36 = vpop.f32.mrb[3].mxu1 }
 0x1b8   :  { %v208_v37 = vpack.c.bf16 %v207_v35, %v207_v35 }
 0x1ba   :  { %506 = vmatmul.mubr.bf16.vlgmr.msra.gmra.mrb[4].mxu0 %v208_v37 }
 0x28d   :  { %v314_v41 = vpop.f32.mrb[4].mxu0 }
 0x28e   :  { %v315_v42 = vadd.f32 %v423_v40, %v314_v41  ;;  %v507_v43 = vpop.f32.mrb[5].mxu0 }
 0x28f   :  { %v317_v44 = vpop.f32.mrb[6].mxu0 }
 0x290   :  { %v320_v45 = vmax.f32 %v315_v42, 0.0  ;;  %v508_v46 = vpop.f32.mrb[7].mxu0 }
 0x292   :  { %v321_v47 = vpack.c.bf16 %v320_v45, %v320_v45 }
 0x294   :  { %518 = vmatmul.mubr.msk.bf16.vlgmr.msra.gmra.mrb[4].mxu1 %vm361_vm2, %v321_v47 }
 0x367   :  { %v399_v49 = vpop.f32.mrb[4].mxu1 }
 0x368   :  { %v400_v50 = vadd.f32 %v432_v48, %v399_v49  ;;  %v519_v51 = vpop.f32.mrb[5].mxu1 }
 0x369   :  { %v402_v52 = vpop.f32.mrb[6].mxu1 }
 0x36a   :  { %406 = vst.msk [vmem:[%s715_s9] sm:$0xff] %vm405_vm3, %v400_v50  ;;  %v520_v53 = vpop.f32.mrb[7].mxu1 }

</bundles_post_ra>
